<compile_context>
chip_gen: v6e
topology: v6e:2x2x1
jax: 0.10.0
libtpu: 0.0.40
codegen_flags: <defaults>
</compile_context>

<pallas_src>
import jax
import jax.numpy as jnp
from jax.experimental import pallas as pl
from jax.experimental.pallas import tpu as pltpu


def _round_up(x, m):
    return ((x + m - 1) // m) * m


def _vmem_budget_bytes():
    """Generation-aware scoped-VMEM budget (leave headroom for the compiler)."""
    cap = 64 * 1024 * 1024  # conservative default = v7x physical VMEM per TC
    try:
        cap = int(getattr(pltpu.get_tpu_info(), "vmem_capacity_bytes", cap))
    except Exception:
        pass
    # v7x (64 MiB) -> 48 MiB; v5e/v6e (128 MiB) -> 96 MiB.
    return min((cap * 3) // 4, 100 * 1024 * 1024)


# ---------------------------------------------------------------------------
# Kernels
# ---------------------------------------------------------------------------
def _linear_block_resident_kernel(x_ref, w_ref, b_ref, o_ref):
    """One (tile_m, tile_n) output tile with the full K dimension in VMEM."""
    acc = jnp.dot(x_ref[...].astype(w_ref.dtype), w_ref[...],
                  preferred_element_type=jnp.float32)
    o_ref[...] = jnp.maximum(acc + b_ref[...], 0.0).astype(o_ref.dtype)
    # TODO(synk): norm='bn'/'in' and activation='lrelu'/'tanh' variants of
    # LinearBlock are not implemented (covers default norm='none', act='relu').


def _linear_block_tiled_kernel(x_ref, w_ref, b_ref, o_ref, acc_ref):
    """K-tiled path: grid=(M_tiles, N_tiles, K_tiles) with K innermost."""
    k = pl.program_id(2)

    @pl.when(k == 0)
    def _():
        # Initialise the accumulator with the broadcast bias: drops the
        # epilogue add entirely.
        acc_ref[...] = jnp.broadcast_to(b_ref[...], acc_ref.shape).astype(
            jnp.float32)

    acc_ref[...] += jnp.dot(x_ref[...].astype(w_ref.dtype), w_ref[...],
                            preferred_element_type=jnp.float32)

    @pl.when(k == pl.num_programs(2) - 1)
    def _():
        o_ref[...] = jnp.maximum(acc_ref[...], 0.0).astype(o_ref.dtype)


# ---------------------------------------------------------------------------
# Parameter prep (one-time, NOT per forward)
# ---------------------------------------------------------------------------
def prepare_linear_block_params(weight, bias, compute_dtype=jnp.bfloat16):
    """nn.Linear weight is (out_dim, in_dim); store it transposed as
    (in_dim, out_dim), zero-padded so K is a multiple of 128 and N a multiple
    of 256 (full MXU width on v6e/v7x), cast to `compute_dtype` (bf16 is the
    MXU-native dtype: half the weight HBM stream, higher MXU rate).  Bias is
    kept f32 for the f32 epilogue."""
    out_dim, in_dim = weight.shape
    kp = _round_up(max(in_dim, 1), 128)
    np_ = _round_up(max(out_dim, 1), 256)
    w_t = jnp.zeros((kp, np_), compute_dtype)
    w_t = w_t.at[:in_dim, :out_dim].set(weight.T.astype(compute_dtype))
    b2 = jnp.zeros((1, np_), jnp.float32).at[0, :out_dim].set(
        bias.astype(jnp.float32))
    return w_t, b2, out_dim


def _pick_tile_m(B, cap):
    if B <= cap:
        return _round_up(B, 8)
    cands = [t for t in (1024, 512, 256, 128) if t <= cap]
    return min(cands, key=lambda t: (_round_up(B, t) - B, -t))


# ---------------------------------------------------------------------------
# Forward
# ---------------------------------------------------------------------------
def linear_block(x, w_t_padded, bias_padded, out_dim, *,
                 force_pallas=False, force_tiled=False):
    """x: (B, in_dim); w_t_padded: (Kp, Np) pre-transposed/padded; bias: (1, Np)."""
    B, in_dim = x.shape
    kp, np_ = w_t_padded.shape
    x_sz = jnp.dtype(x.dtype).itemsize
    w_sz = jnp.dtype(w_t_padded.dtype).itemsize

    # Tiny layers: a pallas_call is pure padding/launch overhead -> plain XLA.
    if not force_pallas and B <= 128 and kp <= 128 and np_ <= 256:
        w = w_t_padded[:in_dim, :out_dim]
        acc = jnp.dot(x.astype(w.dtype), w, preferred_element_type=jnp.float32)
        return jnp.maximum(acc + bias_padded[:, :out_dim], 0.0).astype(x.dtype)

    budget = _vmem_budget_bytes()
    slack = 2 * 1024 * 1024

    def _pad_x(bp):
        pad_m, pad_k = bp - B, kp - in_dim
        return jnp.pad(x, ((0, pad_m), (0, pad_k))) if (pad_m or pad_k) else x

    # ---- Path A: resident weight (W^T stays in VMEM for the whole call) ----
    plan = None
    if not force_tiled:
        if B <= 1024:
            m_cands = [_round_up(B, 8)]
            m_cands += [t for t in (512, 256, 128) if t < m_cands[0]]
        else:
            m_cands = sorted((1024, 512, 256, 128),
                             key=lambda t: (_round_up(B, t) - B, -t))
        for tm in m_cands:
            bp_c = _round_up(B, tm)
            # Split N when there is a single M tile so both v7x TCs get work.
            tn = np_ // 2 if (bp_c // tm == 1 and np_ >= 512) else np_
            fp = (2 * kp * tn * w_sz          # W^T slab (double-buffer bound)
                  + 2 * tm * kp * x_sz        # x tile
                  + 2 * tm * tn * x_sz        # output tile
                  + 2 * np_ * 4)              # bias
            if fp + slack <= budget:
                plan = (tm, bp_c, tn)
                break

    if plan is not None:
        tile_m, bp, tile_n = plan
        grid = (bp // tile_m, np_ // tile_n)
        out_padded = pl.pallas_call(
            _linear_block_resident_kernel,
            out_shape=jax.ShapeDtypeStruct((bp, np_), x.dtype),
            grid_spec=pltpu.PrefetchScalarGridSpec(
                num_scalar_prefetch=0,
                grid=grid,
                in_specs=[
                    pl.BlockSpec((tile_m, kp), lambda i, j: (i, 0)),
                    pl.BlockSpec((kp, tile_n), lambda i, j: (0, j)),
                    pl.BlockSpec((1, tile_n), lambda i, j: (0, j)),
                ],
                out_specs=pl.BlockSpec((tile_m, tile_n), lambda i, j: (i, j)),
            ),
            compiler_params=pltpu.CompilerParams(
                dimension_semantics=("parallel", "parallel"),
                vmem_limit_bytes=budget,
            ),
        )(_pad_x(bp), w_t_padded, bias_padded)
        return out_padded[:B, :out_dim]

    # ---- Path B: K-tiled accumulation (very large weights) ----
    tile_m = _pick_tile_m(B, 512)
    bp = _round_up(B, tile_m)
    tile_n = 512 if np_ % 512 == 0 else 256
    tile_k = next(t for t in (2048, 1024, 512, 256, 128) if kp % t == 0)

    def _nbuf(tm, tk):
        # Triple-buffer streamed tiles in the weight-stream-bound regime.
        return 3 if (kp // tk >= 3 and tm <= 256) else 2

    def _fp(tm, tk, tn):
        nb = _nbuf(tm, tk)
        return (nb * tm * tk * x_sz + nb * tk * tn * w_sz
                + 2 * tm * tn * x_sz + 2 * tn * 4 + tm * tn * 4)

    while _fp(tile_m, tile_k, tile_n) + slack > budget and tile_k > 128:
        tile_k //= 2
    while _fp(tile_m, tile_k, tile_n) + slack > budget and tile_m > 128:
        tile_m = _round_up(max(tile_m // 2, 128), 8)
        bp = _round_up(B, tile_m)

    nbuf = _nbuf(tile_m, tile_k)
    if nbuf == 3:
        x_spec = pl.BlockSpec((tile_m, tile_k), lambda i, j, k: (i, k),
                              pipeline_mode=pl.Buffered(3))
        w_spec = pl.BlockSpec((tile_k, tile_n), lambda i, j, k: (k, j),
                              pipeline_mode=pl.Buffered(3))
    else:
        x_spec = pl.BlockSpec((tile_m, tile_k), lambda i, j, k: (i, k))
        w_spec = pl.BlockSpec((tile_k, tile_n), lambda i, j, k: (k, j))

    grid = (bp // tile_m, np_ // tile_n, kp // tile_k)
    out_padded = pl.pallas_call(
        _linear_block_tiled_kernel,
        out_shape=jax.ShapeDtypeStruct((bp, np_), x.dtype),
        grid_spec=pltpu.PrefetchScalarGridSpec(
            num_scalar_prefetch=0,
            grid=grid,
            in_specs=[
                x_spec,
                w_spec,
                pl.BlockSpec((1, tile_n), lambda i, j, k: (0, j)),
            ],
            out_specs=pl.BlockSpec((tile_m, tile_n), lambda i, j, k: (i, j)),
            scratch_shapes=[pltpu.VMEM((tile_m, tile_n), jnp.float32)],
        ),
        compiler_params=pltpu.CompilerParams(
            dimension_semantics=("parallel", "parallel", "arbitrary"),
            vmem_limit_bytes=budget,
        ),
    )(_pad_x(bp), w_t_padded, bias_padded)
    return out_padded[:B, :out_dim]


def linear_block_ref(x, weight, bias):
    y = jnp.dot(x, weight.T, precision=jax.lax.Precision.HIGHEST)
    return jnp.maximum(y + bias, 0.0)


if __name__ == "__main__":
    key = jax.random.PRNGKey(0)
    k1, k2, k3, k4, k5, k6, k7, k8, k9 = jax.random.split(key, 9)

    # --- Test 1: module config (in_dim=32, out_dim=32, norm='none',
    # activation='relu'), f32 params, resident-weight kernel path. ---
    B, in_dim, out_dim = 8, 32, 32
    bound = 1.0 / (in_dim ** 0.5)
    w1 = jax.random.uniform(k1, (out_dim, in_dim), jnp.float32, -bound, bound)
    b1 = jax.random.uniform(k2, (out_dim,), jnp.float32, -bound, bound)
    x1 = jax.random.normal(k3, (B, in_dim), jnp.float32)
    wt1, bb1, od1 = prepare_linear_block_params(w1, b1, compute_dtype=jnp.float32)
    out1 = jax.block_until_ready(linear_block(x1, wt1, bb1, od1, force_pallas=True))
    ref1 = linear_block_ref(x1, w1, b1)
    assert out1.shape == (B, out_dim)
    assert jnp.allclose(out1, ref1, atol=1e-3, rtol=1e-3)
    # Tiny-layer XLA fallback dispatch gives the same answer.
    out1b = jax.block_until_ready(linear_block(x1, wt1, bb1, od1))
    assert jnp.allclose(out1b, ref1, atol=1e-3, rtol=1e-3)

    # --- Test 2: bf16 weight path + N split across TensorCores (resident). ---
    B2, in2, out2 = 300, 200, 300
    bound2 = 1.0 / (in2 ** 0.5)
    w2 = jax.random.uniform(k4, (out2, in2), jnp.float32, -bound2, bound2)
    b2v = jax.random.uniform(k5, (out2,), jnp.float32, -bound2, bound2)
    x2 = jax.random.normal(k6, (B2, in2), jnp.float32)
    wt2, bb2, od2 = prepare_linear_block_params(w2, b2v, compute_dtype=jnp.bfloat16)
    o2 = jax.block_until_ready(linear_block(x2, wt2, bb2, od2))
    x2r = x2.astype(jnp.bfloat16).astype(jnp.float32)
    w2r = w2.astype(jnp.bfloat16).astype(jnp.float32)
    ref2 = linear_block_ref(x2r, w2r, b2v)
    assert o2.shape == (B2, out2)
    assert jnp.allclose(o2, ref2, atol=1e-2, rtol=1e-2)

    # --- Test 3: K-tiled accumulator path with triple buffering (f32). ---
    B3, in3, out3 = 8, 640, 96
    bound3 = 1.0 / (in3 ** 0.5)
    w3 = jax.random.uniform(k7, (out3, in3), jnp.float32, -bound3, bound3)
    b3 = jax.random.uniform(k8, (out3,), jnp.float32, -bound3, bound3)
    x3 = jax.random.normal(k9, (B3, in3), jnp.float32)
    wt3, bb3, od3 = prepare_linear_block_params(w3, b3, compute_dtype=jnp.float32)
    o3 = jax.block_until_ready(
        linear_block(x3, wt3, bb3, od3, force_pallas=True, force_tiled=True))
    ref3 = linear_block_ref(x3, w3, b3)
    assert o3.shape == (B3, out3)
    assert jnp.allclose(o3, ref3, atol=1e-3, rtol=1e-3)

    print("KERNEL_OK")
</pallas_src>

<mosaic_0001>
module attributes {stable_mosaic.version = 11 : i64} {
  func.func @_linear_block_resident_kernel(%arg0: i32, %arg1: i32, %arg2: memref<8x128xf32, #tpu.memory_space<vmem>>, %arg3: memref<128x256xf32, #tpu.memory_space<vmem>>, %arg4: memref<1x256xf32, #tpu.memory_space<vmem>>, %arg5: memref<8x256xf32, #tpu.memory_space<vmem>>) attributes {dimension_semantics = [#tpu.dimension_semantics<parallel>, #tpu.dimension_semantics<parallel>], iteration_bounds = array<i64: 1, 1>, scalar_prefetch = 0 : i64, scratch_operands = 0 : i64, tpu.core_type = #tpu.core_type<tc>, window_params = [{transform_indices = @transform_0, window_bounds = array<i64: 8, 128>}, {transform_indices = @transform_1, window_bounds = array<i64: 128, 256>}, {transform_indices = @transform_2, window_bounds = array<i64: 1, 256>}, {transform_indices = @transform_3, window_bounds = array<i64: 8, 256>}]} {
    %c0 = arith.constant 0 : index
    %c0_0 = arith.constant 0 : index
    %0 = vector.load %arg2[%c0, %c0_0] : memref<8x128xf32, #tpu.memory_space<vmem>>, vector<8x128xf32>
    %c0_1 = arith.constant 0 : index
    %c0_2 = arith.constant 0 : index
    %1 = vector.load %arg3[%c0_1, %c0_2] : memref<128x256xf32, #tpu.memory_space<vmem>>, vector<128x256xf32>
    %cst = arith.constant dense<0.000000e+00> : vector<8x256xf32>
    %2 = tpu.matmul %0, %1, %cst {dimension_numbers = #tpu.dot_dimension_numbers<[1], [0], [0], [1], [0, 0, 1, 1], [], []>} : vector<8x128xf32>, vector<128x256xf32>, vector<8x256xf32> -> vector<8x256xf32>
    %c0_3 = arith.constant 0 : index
    %c0_4 = arith.constant 0 : index
    %3 = vector.load %arg4[%c0_3, %c0_4] : memref<1x256xf32, #tpu.memory_space<vmem>>, vector<1x256xf32>
    %4 = vector.broadcast %3 : vector<1x256xf32> to vector<8x256xf32>
    %5 = arith.addf %2, %4 : vector<8x256xf32>
    %cst_5 = arith.constant 0.000000e+00 : f32
    %6 = vector.broadcast %cst_5 : f32 to vector<8x256xf32>
    %7 = arith.maximumf %5, %6 : vector<8x256xf32>
    %c0_6 = arith.constant 0 : index
    %c0_7 = arith.constant 0 : index
    %8 = vector.load %arg5[%c0_6, %c0_7] : memref<8x256xf32, #tpu.memory_space<vmem>>, vector<8x256xf32>
    tpu.vector_store %arg5[%c0_6, %c0_7], %7 {strides = array<i32>} : memref<8x256xf32, #tpu.memory_space<vmem>>, vector<8x256xf32>,
    return
  }
  func.func @transform_0(%arg0: i32, %arg1: i32) -> (i32, i32) {
    %c0_i32 = arith.constant 0 : i32
    %c0_i32_0 = arith.constant 0 : i32
    return %arg0, %c0_i32 : i32, i32
  }
  func.func @transform_1(%arg0: i32, %arg1: i32) -> (i32, i32) {
    %c0_i32 = arith.constant 0 : i32
    %c0_i32_0 = arith.constant 0 : i32
    return %c0_i32, %arg1 : i32, i32
  }
  func.func @transform_2(%arg0: i32, %arg1: i32) -> (i32, i32) {
    %c0_i32 = arith.constant 0 : i32
    %c0_i32_0 = arith.constant 0 : i32
    return %c0_i32, %arg1 : i32, i32
  }
  func.func @transform_3(%arg0: i32, %arg1: i32) -> (i32, i32) {
    %c0_i32 = arith.constant 0 : i32
    return %arg0, %arg1 : i32, i32
  }
}

</mosaic_0001>

<bundles_post_ra>
// kernel: tpu_custom_call.1
= control target key start
LH: loop header
LB: loop body
LE: loop exit
PB: predicated region body
PF: predicated region fallthrough
CT: control target
= control target key end

     0   :  { %8 = vsyncpa [#allocation3], 0  ;;  %s287_s0 = inlined_call_operand.hbm [shape: f32[8,128], index: 0, kind: input, shape index: {}]   ;;  %s288_s1 = inlined_call_operand.hbm [shape: f32[128,256], index: 1, kind: input, shape index: {}]   ;;  %s289_s2 = inlined_call_operand.vmem [shape: f32[1,256], index: 2, kind: input, shape index: {}]   ;;  %s290_s3 = inlined_call_operand.hbm [shape: f32[8,256], index: 3, kind: output, shape index: {}]  }
   0x1   :  { %9 = vsyncpa [#allocation6], 0 }
   0x2   :  { %10 = vsyncpa [#allocation4], 0  ;;  %s249_s12 = smov [#allocation2]   ;;  %s250_s14 = smov [#allocation5]  }
   0x3   :  { %s17_s13 = sshll.u32 %s249_s12, 4  ;;  %s26_s15 = sshll.u32 %s250_s14, 4  ;;  %s18_s13 = int_to_ptr.vmem [resolvable:$true] %s17_s13  ;;  %s27_s15 = int_to_ptr.vmem [resolvable:$true] %s26_s15 }
   0x4   :  { %s191_s16 = scalar_lea.vmem %s18_s13, 128  ;;  %p196_p1 = scmp.lt.s32.totalorder %s18_s13, %s18_s13 }
   0x5   :  { %p192_p0 = scmp.ne.s32.totalorder %s18_s13, %s191_s16  ;;  %p197_p2 = scmp.lt.s32.totalorder %s191_s16, %s191_s16 }
   0x7   :  { %p198_p3 = por %p197_p2, %p196_p1 }
   0x9   :  { %p199_p4 = pnand %p198_p3, %p192_p0 }
   0xb   :  { %202 = shalt.err (!%p199_p4)
}
   0xc   :  { %20 = dma.hbm_to_vmem [thread:$0]  %s287_s0, 128, %s18_s13, [#allocation3]  }
   0xd   :  { %s211_s19 = scalar_lea.vmem %s27_s15, 4096  ;;  %p216_p6 = scmp.lt.s32.totalorder %s27_s15, %s27_s15 }
   0xe   :  { %p212_p5 = scmp.ne.s32.totalorder %s27_s15, %s211_s19  ;;  %p217_p7 = scmp.lt.s32.totalorder %s211_s19, %s211_s19 }
  0x10   :  { %p218_p8 = por %p217_p7, %p216_p6 }
  0x12   :  { %p219_p9 = pnand %p218_p8, %p212_p5 }
  0x14   :  { %222 = shalt.err (!%p219_p9)
}
  0x15   :  { %s251_s20 = smov 256   ;;  %s252_s21 = smov 16  }
  0x16   :  { %32 = dma.hbm_to_vmem [thread:$0]  %s288_s1, 4096, %s27_s15, [#allocation6], %s251_s20, %s251_s20, %s252_s21  }
  0x17   :  { %243 = dma.done.wait [#allocation3], 128  }
  0x18   :  { %244 = vsyncadd [#allocation3], 4294967168 }
  0x19   :  { %245 = dma.done.wait [#allocation6], 4096  }
  0x1a   :  { %246 = vsyncadd [#allocation6], 4294963200  ;;  %v253_v0 = vmov 0.0   ;;  %v73_v1 = vld [vmem:[#allocation5 + $0xf8] sm:$0xff]  ;;  %v72_v2 = vld [vmem:[#allocation5 + $0xf0] sm:$0xff]  ;;  %v76_v34 = vlaneseq  ;;  %s254_s24 = smov [#allocation7]  }
  0x1b   :  { %150 = vmatprep.mubr.f32.mxu0 %v253_v0  ;;  %v71_v3 = vld [vmem:[#allocation5 + $0xe8] sm:$0xff]  ;;  %86 = vmatprep.subr.mxu0 %v73_v1  ;;  %v70_v4 = vld [vmem:[#allocation5 + $0xe0] sm:$0xff]  ;;  %v69_v5 = vld [vmem:[#allocation5 + $0xd8] sm:$0xff]  ;;  %s167_s25 = sshll.u32 %s254_s24, 4  ;;  %s168_s25 = int_to_ptr.vmem [resolvable:$true] %s167_s25 }
  0x1c   :  { %87 = vmatpush1.msra.mxu0 %v72_v2  ;;  %v68_v6 = vld [vmem:[#allocation5 + $0xd0] sm:$0xff]  ;;  %v67_v7 = vld [vmem:[#allocation5 + $0xc8] sm:$0xff]  ;;  %v66_v8 = vld [vmem:[#allocation5 + $0xc0] sm:$0xff]  ;;  %v77_v35 = vshrl.u32 %v76_v34, 7  ;;  %s223_s26 = scalar_lea.vmem %s168_s25, 256  ;;  %p228_p11 = scmp.lt.s32.totalorder %s168_s25, %s168_s25 }
  0x1d   :  { %88 = vmatprep.subr.mxu0 %v71_v3  ;;  %v65_v9 = vld [vmem:[#allocation5 + $0xb8] sm:$0xff]  ;;  %v64_v10 = vld [vmem:[#allocation5 + $0xb0] sm:$0xff]  ;;  %v63_v11 = vld [vmem:[#allocation5 + $0xa8] sm:$0xff]  ;;  %p224_p10 = scmp.ne.s32.totalorder %s168_s25, %s223_s26  ;;  %p229_p12 = scmp.lt.s32.totalorder %s223_s26, %s223_s26 }
  0x1e   :  { %89 = vmatpush1.msra.mxu0 %v70_v4  ;;  %v62_v12 = vld [vmem:[#allocation5 + $0xa0] sm:$0xff]  ;;  %v61_v13 = vld [vmem:[#allocation5 + $0x98] sm:$0xff]  ;;  %v60_v14 = vld [vmem:[#allocation5 + $0x90] sm:$0xff]  ;;  %v78_v36 = vsub.s32 0, %v77_v35  ;;  %v82_v38 = vsub.s32 1, %v77_v35 }
  0x1f   :  { %90 = vmatprep.subr.mxu0 %v69_v5  ;;  %v59_v15 = vld [vmem:[#allocation5 + $0x88] sm:$0xff]  ;;  %v58_v16 = vld [vmem:[#allocation5 + $0x80] sm:$0xff]  ;;  %v57_v17 = vld [vmem:[#allocation5 + $0x78] sm:$0xff]  ;;  %p230_p13 = por %p229_p12, %p228_p11 }
  0x20   :  { %91 = vmatpush1.msra.mxu0 %v68_v6  ;;  %v56_v18 = vld [vmem:[#allocation5 + $0x70] sm:$0xff]  ;;  %v55_v19 = vld [vmem:[#allocation5 + $0x68] sm:$0xff]  ;;  %v54_v20 = vld [vmem:[#allocation5 + $0x60] sm:$0xff] }
  0x21   :  { %92 = vmatprep.subr.mxu0 %v67_v7  ;;  %v53_v21 = vld [vmem:[#allocation5 + $0x58] sm:$0xff]  ;;  %v52_v22 = vld [vmem:[#allocation5 + $0x50] sm:$0xff]  ;;  %v51_v23 = vld [vmem:[#allocation5 + $0x48] sm:$0xff]  ;;  %p231_p0 = pnand %p230_p13, %p224_p10 }
  0x22   :  { %93 = vmatpush1.msra.mxu0 %v66_v8  ;;  %v50_v24 = vld [vmem:[#allocation5 + $0x40] sm:$0xff]  ;;  %v49_v25 = vld [vmem:[#allocation5 + $0x38] sm:$0xff]  ;;  %v48_v26 = vld [vmem:[#allocation5 + $0x30] sm:$0xff] }
  0x23   :  { %94 = vmatprep.subr.mxu0 %v65_v9  ;;  %v47_v27 = vld [vmem:[#allocation5 + $0x28] sm:$0xff]  ;;  %v46_v28 = vld [vmem:[#allocation5 + $0x20] sm:$0xff]  ;;  %v45_v29 = vld [vmem:[#allocation5 + $0x18] sm:$0xff] }
  0x24   :  { %95 = vmatpush1.msra.mxu0 %v64_v10  ;;  %v44_v30 = vld [vmem:[#allocation5 + $0x10] sm:$0xff]  ;;  %v43_v31 = vld [vmem:[#allocation5 + $0x8] sm:$0xff]  ;;  %v42_v32 = vld [vmem:[#allocation5] sm:$0xff] }
  0x25   :  { %96 = vmatprep.subr.mxu0 %v63_v11  ;;  %v41_v33 = vld [vmem:[#allocation2] sm:$0xff] }
  0x26   :  { %97 = vmatpush1.msra.mxu0 %v62_v12  ;;  %v74_v37 = vld [vmem:[%s289_s2] sm:$0x3] }
  0x27   :  { %98 = vmatprep.subr.mxu0 %v61_v13  ;;  %v79_v39 = vrot.slane %v74_v37, %v78_v36  ;;  %v83_v40 = vrot.slane %v74_v37, %v82_v38 }
  0x28   :  { %99 = vmatpush1.msra.mxu0 %v60_v14 }
  0x29   :  { %100 = vmatprep.subr.mxu0 %v59_v15 }
  0x2a   :  { %101 = vmatpush1.msra.mxu0 %v58_v16 }
  0x2b   :  { %102 = vmatprep.subr.mxu0 %v57_v17 }
  0x2c   :  { %103 = vmatpush1.msra.mxu0 %v56_v18 }
  0x2d   :  { %104 = vmatprep.subr.mxu0 %v55_v19 }
  0x2e   :  { %105 = vmatpush1.msra.mxu0 %v54_v20 }
  0x2f   :  { %106 = vmatprep.subr.mxu0 %v53_v21 }
  0x30   :  { %107 = vmatpush1.msra.mxu0 %v52_v22 }
  0x31   :  { %108 = vmatprep.subr.mxu0 %v51_v23 }
  0x32   :  { %109 = vmatpush1.msra.mxu0 %v50_v24 }
  0x33   :  { %110 = vmatprep.subr.mxu0 %v49_v25 }
  0x34   :  { %111 = vmatpush1.msra.mxu0 %v48_v26 }
  0x35   :  { %112 = vmatprep.subr.mxu0 %v47_v27 }
  0x36   :  { %113 = vmatpush1.msra.mxu0 %v46_v28 }
  0x37   :  { %114 = vmatprep.subr.mxu0 %v45_v29 }
  0x38   :  { %115 = vmatpush1.msra.mxu0 %v44_v30 }
  0x39   :  { %116 = vmatprep.subr.mxu0 %v43_v31 }
  0x3a   :  { %117 = vmatpush1.msra.mxu0 %v42_v32 }
  0x3b   :  { %151 = vmatmul.mubr.f32.vlgmr.msra.gmra.mxu0 %v41_v33 }
  0xfb   :  { %v152_v41 = vpop.f32.mrf.mxu0 }
  0xfc   :  { %v153_v42 = vadd.f32 %v152_v41, %v79_v39 }
  0xfd   :  { %v154_v43 = vpop.f32.mrf.mxu0 }
  0xfe   :  { %v157_v44 = vmax.f32 %v153_v42, 0.0  ;;  %v155_v45 = vadd.f32 %v154_v43, %v83_v40 }
 0x100   :  { %159 = vst [vmem:[#allocation7] sm:$0xff] %v157_v44  ;;  %v158_v46 = vmax.f32 %v155_v45, 0.0 }
 0x102   :  { %160 = vst [vmem:[#allocation7 + $0x8] sm:$0xff] %v158_v46 }
 0x103   :  { %234 = shalt.err (!%p231_p0)
}
 0x104   :  { %170 = dma.vmem_to_hbm [thread:$0]  %s168_s25, 256, %s290_s3, [#allocation4]  }
 0x105   :  { %247 = dma.done.wait [#allocation4], 256  }
 0x106   :  { %248 = vsyncadd [#allocation4], 4294967040 }
 0x107   :  { %174 = vsyncpa [#allocation3], 1 }
 0x108   :  { %175 = vsyncpa [#allocation6], 1 }
 0x109   :  { %176 = vsyncpa [#allocation4], 1 }

</bundles_post_ra>
